<compile_context>
chip_gen: v7x
topology: tpu7x:2x2x1
jax: 0.10.0
libtpu: 0.0.40
codegen_flags: <defaults>
</compile_context>

<pallas_src>
import functools

import jax
import jax.numpy as jnp
from jax.experimental import pallas as pl
from jax.experimental.pallas import tpu as pltpu


def _conv_proj_kernel(x_ref, w_ref, b_ref, g_ref, beta_ref, o_ref, *,
                      num_layers, k, width):
    """All layers fused in one kernel invocation (everything fits in VMEM).

    x_ref    : (B*W, C)        channels-last rows (f32)
    w_ref    : (L, K, C, C)    bf16 weights; w_ref[l, dk] = w_pt[l,:,:,dk].T
    b_ref    : (L, 1, C)       conv bias (f32)
    g_ref    : (L, 1, C)       batchnorm gamma (f32)
    beta_ref : (L, 1, C)       batchnorm beta (f32)
    o_ref    : (B*W, C)        channels-last output (f32)
    """
    n_rows, C = x_ref.shape
    pad = (k - 1) // 2
    eps = 1e-5
    inv_n = 1.0 / float(n_rows)

    # ---- boundary masks for the shifted taps: hoisted, broadcast once, as
    # ---- 0/1 bf16 multiplies (no per-layer select / broadcast re-emission).
    offsets = [dk - pad for dk in range(k)]
    w_pos = jax.lax.broadcasted_iota(jnp.int32, (n_rows, 1), 0) % width
    masks = {}
    for d in offsets:
        if d != 0:
            valid = (w_pos + d >= 0) & (w_pos + d < width)           # (M, 1)
            masks[d] = jnp.broadcast_to(valid, (n_rows, C)).astype(jnp.bfloat16)

    # bf16 activations feeding the MXU; BN / output math stays f32.
    x = x_ref[...].astype(jnp.bfloat16)                              # (M, C)

    for l in range(num_layers):
        # ---- K accumulating matmuls (C-deep each), f32 accumulation --------
        y = None
        for di, d in enumerate(offsets):
            if d == 0:
                tap = x
            else:
                # rows shifted by d within each batch element; batch-boundary
                # rows (the conv zero padding) are masked to 0 by multiply.
                tap = jnp.roll(x, -d, axis=0) * masks[d]
            contrib = jnp.dot(tap, w_ref[l, di],
                              preferred_element_type=jnp.float32)
            y = contrib if y is None else y + contrib

        # ---- BatchNorm1d training-mode stats over (batch, width) -----------
        # Single pass, but centered on a per-channel pivot (first row) to
        # avoid E[y^2]-E[y]^2 cancellation for deep non-negative activations.
        pivot = y[0:1, :]                                            # (1, C)
        yc = y - pivot
        s1 = jnp.sum(yc, axis=0, keepdims=True)                      # (1, C)
        s2 = jnp.sum(yc * yc, axis=0, keepdims=True)                 # (1, C)
        mean_c = s1 * inv_n
        var = jnp.maximum(s2 * inv_n - mean_c * mean_c, 0.0)
        mean_z = mean_c + pivot          # mean of conv output (without bias)

        b_l = b_ref[l]                   # (1, C)
        g_l = g_ref[l]
        beta_l = beta_ref[l]

        scale = g_l * jax.lax.rsqrt(var + eps)
        mean = mean_z + b_l              # mean of (conv + bias)
        shift = beta_l + (b_l - mean) * scale   # bias cancels inside BN

        # conv-bias + BN affine + ReLU fused in one multiply-add + max pass.
        act = y * scale + shift
        if l + 1 < num_layers:
            x = jnp.maximum(act, 0.0).astype(jnp.bfloat16)
        else:
            o_ref[...] = jnp.maximum(act, 0.0).astype(o_ref.dtype)


def _vmem_budget_bytes(B, W, C, L, K):
    """Derived resident-footprint estimate (with headroom), capped for v7x."""
    act = B * W * C
    resident = (
        2 * act * 4          # f32 input + f32 output
        + act * 2            # bf16 inter-layer activations
        + 3 * act * 4        # y + temporaries headroom
        + L * K * C * C * 2  # bf16 weights
        + 4 * L * C * 4      # bias / gamma / beta / misc params
    )
    budget = 2 * resident + (4 << 20)          # 2x headroom + 4 MiB slack
    return int(min(max(budget, 8 << 20), 48 << 20))


def conv_projection_1d(x_ncw, w_k, bias_k, gamma_k, beta_k):
    """x_ncw: (B, C, W) like PyTorch. Returns (B, C, W) float32.

    w_k: (L, K, Cin, Cout) bf16; bias_k/gamma_k/beta_k: (L, 1, C) f32.
    """
    B, C, W = x_ncw.shape
    L, K, _, _ = w_k.shape
    M = B * W

    # Layout plumbing in the wrapper: lane-dense channels-last rows.
    x_rows = jnp.transpose(x_ncw, (0, 2, 1)).reshape(M, C)

    kernel = functools.partial(_conv_proj_kernel, num_layers=L, k=K, width=W)

    cost = pl.CostEstimate(
        flops=2 * L * M * K * C * C,
        transcendentals=0,
        bytes_accessed=(2 * M * C * 4          # in + out (f32)
                        + L * K * C * C * 2    # weights (bf16)
                        + 3 * L * C * 4),      # per-channel params
    )

    out_rows = pl.pallas_call(
        kernel,
        out_shape=jax.ShapeDtypeStruct((M, C), jnp.float32),
        in_specs=[pl.BlockSpec(memory_space=pltpu.MemorySpace.VMEM)] * 5,
        out_specs=pl.BlockSpec(memory_space=pltpu.MemorySpace.VMEM),
        compiler_params=pltpu.CompilerParams(
            vmem_limit_bytes=_vmem_budget_bytes(B, W, C, L, K)),
        cost_estimate=cost,
    )(x_rows, w_k, bias_k, gamma_k, beta_k)

    return jnp.transpose(out_rows.reshape(B, W, C), (0, 2, 1))


def ref_forward(x, w_pt, bias, gamma, beta, eps=1e-5):
    """Pure-JAX f32 reference in PyTorch NCW layout / PyTorch weight layout."""
    L, O, Ci, K = w_pt.shape
    B, C, W = x.shape
    pad = (K - 1) // 2
    for l in range(L):
        xpad = jnp.pad(x, ((0, 0), (0, 0), (pad, pad)))
        y = jnp.zeros((B, O, W), jnp.float32)
        for dk in range(K):
            y = y + jnp.einsum('oc,bcw->bow', w_pt[l, :, :, dk],
                               xpad[:, :, dk:dk + W])
        y = y + bias[l][None, :, None]
        mean = jnp.mean(y, axis=(0, 2), keepdims=True)
        var = jnp.mean((y - mean) ** 2, axis=(0, 2), keepdims=True)
        y = (y - mean) / jnp.sqrt(var + eps)
        y = y * gamma[l][None, :, None] + beta[l][None, :, None]
        x = jax.nn.relu(y)
    return x


if __name__ == "__main__":
    # Small shapes consistent with the module (real module: C=256, W=40).
    B, C, W = 2, 32, 16
    L, K = 2, 3

    key = jax.random.PRNGKey(0)
    k1, k2, k3, k4, k5 = jax.random.split(key, 5)

    x = jax.random.normal(k1, (B, C, W), jnp.float32)

    # Deterministic synthetic parameters (PyTorch conv weight layout: (O, Cin, K)).
    w_pt = 0.1 * jax.random.normal(k2, (L, C, C, K), jnp.float32)
    bias = 0.1 * jax.random.normal(k3, (L, C), jnp.float32)
    gamma = 1.0 + 0.1 * jax.random.normal(k4, (L, C), jnp.float32)
    beta = 0.1 * jax.random.normal(k5, (L, C), jnp.float32)

    # Kernel-side weight layout: (L, K, Cin, Cout), bf16 for the MXU.
    w_k = jnp.transpose(w_pt, (0, 3, 2, 1)).astype(jnp.bfloat16)
    bias_k = bias[:, None, :]                    # (L, 1, C) f32
    gamma_k = gamma[:, None, :]
    beta_k = beta[:, None, :]

    out = conv_projection_1d(x, w_k, bias_k, gamma_k, beta_k)
    out = jax.block_until_ready(out)

    ref = ref_forward(x, w_pt, bias, gamma, beta)

    assert out.shape == (B, C, W)
    max_err = float(jnp.max(jnp.abs(out - ref)))
    # bf16 MXU operands vs a pure-f32 reference -> allow a few % deviation.
    assert jnp.allclose(out, ref, rtol=5e-2, atol=5e-2), max_err
    print("KERNEL_OK")
</pallas_src>

<mosaic_0001>
module attributes {stable_mosaic.version = 11 : i64} {
  func.func @_conv_proj_kernel(%arg0: memref<32x32xf32, #tpu.memory_space<vmem>>, %arg1: memref<2x3x32x32xbf16, #tpu.memory_space<vmem>>, %arg2: memref<2x1x32xf32, #tpu.memory_space<vmem>>, %arg3: memref<2x1x32xf32, #tpu.memory_space<vmem>>, %arg4: memref<2x1x32xf32, #tpu.memory_space<vmem>>, %arg5: memref<32x32xf32, #tpu.memory_space<vmem>>) attributes {dimension_semantics = [], scalar_prefetch = 0 : i64, scratch_operands = 0 : i64, tpu.core_type = #tpu.core_type<tc>} {
    %0 = tpu.iota {dimensions = array<i32: 0>} : vector<32x1xi32>
    %c16_i32 = arith.constant 16 : i32
    %c0_i32 = arith.constant 0 : i32
    %1 = arith.cmpi eq, %c16_i32, %c0_i32 : i32
    %c1_i32 = arith.constant 1 : i32
    %2 = arith.select %1, %c1_i32, %c16_i32 : i32
    %3 = vector.broadcast %2 : i32 to vector<32x1xi32>
    %4 = arith.remsi %0, %3 : vector<32x1xi32>
    %c0_i32_0 = arith.constant 0 : i32
    %5 = vector.broadcast %c0_i32_0 : i32 to vector<32x1xi32>
    %6 = arith.cmpi ne, %4, %5 : vector<32x1xi32>
    %c0_i32_1 = arith.constant 0 : i32
    %7 = vector.broadcast %c0_i32_1 : i32 to vector<32x1xi32>
    %8 = arith.cmpi slt, %4, %7 : vector<32x1xi32>
    %c0_i32_2 = arith.constant 0 : i32
    %9 = arith.cmpi slt, %2, %c0_i32_2 : i32
    %10 = vector.broadcast %9 : i1 to vector<32x1xi1>
    %11 = vector.broadcast %10 : vector<32x1xi1> to vector<32x1xi1>
    %12 = arith.xori %8, %11 : vector<32x1xi1>
    %13 = arith.andi %12, %6 : vector<32x1xi1>
    %14 = vector.broadcast %2 : i32 to vector<32x1xi32>
    %15 = arith.addi %4, %14 : vector<32x1xi32>
    %16 = arith.select %13, %15, %4 : vector<32x1xi1>, vector<32x1xi32>
    %c-1_i32 = arith.constant -1 : i32
    %17 = vector.broadcast %c-1_i32 : i32 to vector<32x1xi32>
    %18 = arith.addi %16, %17 : vector<32x1xi32>
    %c0_i32_3 = arith.constant 0 : i32
    %19 = vector.broadcast %c0_i32_3 : i32 to vector<32x1xi32>
    %20 = arith.cmpi sge, %18, %19 : vector<32x1xi32>
    %c-1_i32_4 = arith.constant -1 : i32
    %21 = vector.broadcast %c-1_i32_4 : i32 to vector<32x1xi32>
    %22 = arith.addi %16, %21 : vector<32x1xi32>
    %c16_i32_5 = arith.constant 16 : i32
    %23 = vector.broadcast %c16_i32_5 : i32 to vector<32x1xi32>
    %24 = arith.cmpi slt, %22, %23 : vector<32x1xi32>
    %25 = arith.andi %20, %24 : vector<32x1xi1>
    %26 = vector.shape_cast %25 : vector<32x1xi1> to vector<32x1xi1>
    %27 = vector.broadcast %26 : vector<32x1xi1> to vector<32x32xi1>
    %28 = arith.extui %27 : vector<32x32xi1> to vector<32x32xi32>
    %29 = arith.sitofp %28 : vector<32x32xi32> to vector<32x32xf32>
    %30 = arith.truncf %29 : vector<32x32xf32> to vector<32x32xbf16>
    %c1_i32_6 = arith.constant 1 : i32
    %31 = vector.broadcast %c1_i32_6 : i32 to vector<32x1xi32>
    %32 = arith.addi %16, %31 : vector<32x1xi32>
    %c0_i32_7 = arith.constant 0 : i32
    %33 = vector.broadcast %c0_i32_7 : i32 to vector<32x1xi32>
    %34 = arith.cmpi sge, %32, %33 : vector<32x1xi32>
    %c1_i32_8 = arith.constant 1 : i32
    %35 = vector.broadcast %c1_i32_8 : i32 to vector<32x1xi32>
    %36 = arith.addi %16, %35 : vector<32x1xi32>
    %c16_i32_9 = arith.constant 16 : i32
    %37 = vector.broadcast %c16_i32_9 : i32 to vector<32x1xi32>
    %38 = arith.cmpi slt, %36, %37 : vector<32x1xi32>
    %39 = arith.andi %34, %38 : vector<32x1xi1>
    %40 = vector.shape_cast %39 : vector<32x1xi1> to vector<32x1xi1>
    %41 = vector.broadcast %40 : vector<32x1xi1> to vector<32x32xi1>
    %42 = arith.extui %41 : vector<32x32xi1> to vector<32x32xi32>
    %43 = arith.sitofp %42 : vector<32x32xi32> to vector<32x32xf32>
    %44 = arith.truncf %43 : vector<32x32xf32> to vector<32x32xbf16>
    %c0 = arith.constant 0 : index
    %c0_10 = arith.constant 0 : index
    %45 = vector.load %arg0[%c0, %c0_10] : memref<32x32xf32, #tpu.memory_space<vmem>>, vector<32x32xf32>
    %46 = arith.truncf %45 : vector<32x32xf32> to vector<32x32xbf16>
    %47 = vector.extract_strided_slice %46 {offsets = [31, 0], sizes = [1, 32], strides = [1, 1]} : vector<32x32xbf16> to vector<1x32xbf16>
    %48 = vector.extract_strided_slice %46 {offsets = [0, 0], sizes = [31, 32], strides = [1, 1]} : vector<32x32xbf16> to vector<31x32xbf16>
    %49 = tpu.concatenate %47, %48 in 0 : vector<1x32xbf16>, vector<31x32xbf16> -> vector<32x32xbf16>
    %50 = arith.mulf %49, %30 : vector<32x32xbf16>
    %c0_11 = arith.constant 0 : index
    %c0_12 = arith.constant 0 : index
    %c0_13 = arith.constant 0 : index
    %c0_14 = arith.constant 0 : index
    %51 = vector.load %arg1[%c0_11, %c0_12, %c0_13, %c0_14] : memref<2x3x32x32xbf16, #tpu.memory_space<vmem>>, vector<1x1x32x32xbf16>
    %52 = vector.shape_cast %51 : vector<1x1x32x32xbf16> to vector<32x32xbf16>
    %cst = arith.constant dense<0.000000e+00> : vector<32x32xf32>
    %53 = tpu.matmul %50, %52, %cst {dimension_numbers = #tpu.dot_dimension_numbers<[1], [0], [0], [1], [0, 0, 1, 1], [], []>} : vector<32x32xbf16>, vector<32x32xbf16>, vector<32x32xf32> -> vector<32x32xf32>
    %c0_15 = arith.constant 0 : index
    %c1 = arith.constant 1 : index
    %c0_16 = arith.constant 0 : index
    %c0_17 = arith.constant 0 : index
    %54 = vector.load %arg1[%c0_15, %c1, %c0_16, %c0_17] : memref<2x3x32x32xbf16, #tpu.memory_space<vmem>>, vector<1x1x32x32xbf16>
    %55 = vector.shape_cast %54 : vector<1x1x32x32xbf16> to vector<32x32xbf16>
    %cst_18 = arith.constant dense<0.000000e+00> : vector<32x32xf32>
    %56 = tpu.matmul %46, %55, %cst_18 {dimension_numbers = #tpu.dot_dimension_numbers<[1], [0], [0], [1], [0, 0, 1, 1], [], []>} : vector<32x32xbf16>, vector<32x32xbf16>, vector<32x32xf32> -> vector<32x32xf32>
    %57 = arith.addf %53, %56 : vector<32x32xf32>
    %58 = vector.extract_strided_slice %46 {offsets = [1, 0], sizes = [31, 32], strides = [1, 1]} : vector<32x32xbf16> to vector<31x32xbf16>
    %59 = vector.extract_strided_slice %46 {offsets = [0, 0], sizes = [1, 32], strides = [1, 1]} : vector<32x32xbf16> to vector<1x32xbf16>
    %60 = tpu.concatenate %58, %59 in 0 : vector<31x32xbf16>, vector<1x32xbf16> -> vector<32x32xbf16>
    %61 = arith.mulf %60, %44 : vector<32x32xbf16>
    %c0_19 = arith.constant 0 : index
    %c2 = arith.constant 2 : index
    %c0_20 = arith.constant 0 : index
    %c0_21 = arith.constant 0 : index
    %62 = vector.load %arg1[%c0_19, %c2, %c0_20, %c0_21] : memref<2x3x32x32xbf16, #tpu.memory_space<vmem>>, vector<1x1x32x32xbf16>
    %63 = vector.shape_cast %62 : vector<1x1x32x32xbf16> to vector<32x32xbf16>
    %cst_22 = arith.constant dense<0.000000e+00> : vector<32x32xf32>
    %64 = tpu.matmul %61, %63, %cst_22 {dimension_numbers = #tpu.dot_dimension_numbers<[1], [0], [0], [1], [0, 0, 1, 1], [], []>} : vector<32x32xbf16>, vector<32x32xbf16>, vector<32x32xf32> -> vector<32x32xf32>
    %65 = arith.addf %57, %64 : vector<32x32xf32>
    %66 = vector.extract_strided_slice %65 {offsets = [0, 0], sizes = [1, 32], strides = [1, 1]} : vector<32x32xf32> to vector<1x32xf32>
    %67 = vector.broadcast %66 : vector<1x32xf32> to vector<32x32xf32>
    %68 = arith.subf %65, %67 : vector<32x32xf32>
    %cst_23 = arith.constant dense<0.000000e+00> : vector<32xf32>
    %69 = vector.multi_reduction <add>, %68, %cst_23 [0] : vector<32x32xf32> to vector<32xf32>
    %70 = vector.shape_cast %69 : vector<32xf32> to vector<1x32xf32>
    %71 = arith.mulf %68, %68 : vector<32x32xf32>
    %cst_24 = arith.constant dense<0.000000e+00> : vector<32xf32>
    %72 = vector.multi_reduction <add>, %71, %cst_24 [0] : vector<32x32xf32> to vector<32xf32>
    %73 = vector.shape_cast %72 : vector<32xf32> to vector<1x32xf32>
    %cst_25 = arith.constant 3.125000e-02 : f32
    %74 = vector.broadcast %cst_25 : f32 to vector<1x32xf32>
    %75 = arith.mulf %70, %74 : vector<1x32xf32>
    %cst_26 = arith.constant 3.125000e-02 : f32
    %76 = vector.broadcast %cst_26 : f32 to vector<1x32xf32>
    %77 = arith.mulf %73, %76 : vector<1x32xf32>
    %78 = arith.mulf %75, %75 : vector<1x32xf32>
    %79 = arith.subf %77, %78 : vector<1x32xf32>
    %cst_27 = arith.constant 0.000000e+00 : f32
    %80 = vector.broadcast %cst_27 : f32 to vector<1x32xf32>
    %81 = arith.maximumf %79, %80 : vector<1x32xf32>
    %82 = arith.addf %75, %66 : vector<1x32xf32>
    %c0_28 = arith.constant 0 : index
    %c0_29 = arith.constant 0 : index
    %c0_30 = arith.constant 0 : index
    %83 = vector.load %arg2[%c0_28, %c0_29, %c0_30] : memref<2x1x32xf32, #tpu.memory_space<vmem>>, vector<1x1x32xf32>
    %84 = vector.shape_cast %83 : vector<1x1x32xf32> to vector<1x32xf32>
    %c0_31 = arith.constant 0 : index
    %c0_32 = arith.constant 0 : index
    %c0_33 = arith.constant 0 : index
    %85 = vector.load %arg3[%c0_31, %c0_32, %c0_33] : memref<2x1x32xf32, #tpu.memory_space<vmem>>, vector<1x1x32xf32>
    %86 = vector.shape_cast %85 : vector<1x1x32xf32> to vector<1x32xf32>
    %c0_34 = arith.constant 0 : index
    %c0_35 = arith.constant 0 : index
    %c0_36 = arith.constant 0 : index
    %87 = vector.load %arg4[%c0_34, %c0_35, %c0_36] : memref<2x1x32xf32, #tpu.memory_space<vmem>>, vector<1x1x32xf32>
    %88 = vector.shape_cast %87 : vector<1x1x32xf32> to vector<1x32xf32>
    %cst_37 = arith.constant 9.99999974E-6 : f32
    %89 = vector.broadcast %cst_37 : f32 to vector<1x32xf32>
    %90 = arith.addf %81, %89 : vector<1x32xf32>
    %91 = math.rsqrt %90 : vector<1x32xf32>
    %92 = arith.mulf %86, %91 : vector<1x32xf32>
    %93 = arith.addf %82, %84 : vector<1x32xf32>
    %94 = arith.subf %84, %93 : vector<1x32xf32>
    %95 = arith.mulf %94, %92 : vector<1x32xf32>
    %96 = arith.addf %88, %95 : vector<1x32xf32>
    %97 = vector.broadcast %92 : vector<1x32xf32> to vector<32x32xf32>
    %98 = arith.mulf %65, %97 : vector<32x32xf32>
    %99 = vector.broadcast %96 : vector<1x32xf32> to vector<32x32xf32>
    %100 = arith.addf %98, %99 : vector<32x32xf32>
    %cst_38 = arith.constant 0.000000e+00 : f32
    %101 = vector.broadcast %cst_38 : f32 to vector<32x32xf32>
    %102 = arith.maximumf %100, %101 : vector<32x32xf32>
    %103 = arith.truncf %102 : vector<32x32xf32> to vector<32x32xbf16>
    %104 = vector.extract_strided_slice %103 {offsets = [31, 0], sizes = [1, 32], strides = [1, 1]} : vector<32x32xbf16> to vector<1x32xbf16>
    %105 = vector.extract_strided_slice %103 {offsets = [0, 0], sizes = [31, 32], strides = [1, 1]} : vector<32x32xbf16> to vector<31x32xbf16>
    %106 = tpu.concatenate %104, %105 in 0 : vector<1x32xbf16>, vector<31x32xbf16> -> vector<32x32xbf16>
    %107 = arith.mulf %106, %30 : vector<32x32xbf16>
    %c1_39 = arith.constant 1 : index
    %c0_40 = arith.constant 0 : index
    %c0_41 = arith.constant 0 : index
    %c0_42 = arith.constant 0 : index
    %108 = vector.load %arg1[%c1_39, %c0_40, %c0_41, %c0_42] : memref<2x3x32x32xbf16, #tpu.memory_space<vmem>>, vector<1x1x32x32xbf16>
    %109 = vector.shape_cast %108 : vector<1x1x32x32xbf16> to vector<32x32xbf16>
    %cst_43 = arith.constant dense<0.000000e+00> : vector<32x32xf32>
    %110 = tpu.matmul %107, %109, %cst_43 {dimension_numbers = #tpu.dot_dimension_numbers<[1], [0], [0], [1], [0, 0, 1, 1], [], []>} : vector<32x32xbf16>, vector<32x32xbf16>, vector<32x32xf32> -> vector<32x32xf32>
    %c1_44 = arith.constant 1 : index
    %c1_45 = arith.constant 1 : index
    %c0_46 = arith.constant 0 : index
    %c0_47 = arith.constant 0 : index
    %111 = vector.load %arg1[%c1_44, %c1_45, %c0_46, %c0_47] : memref<2x3x32x32xbf16, #tpu.memory_space<vmem>>, vector<1x1x32x32xbf16>
    %112 = vector.shape_cast %111 : vector<1x1x32x32xbf16> to vector<32x32xbf16>
    %cst_48 = arith.constant dense<0.000000e+00> : vector<32x32xf32>
    %113 = tpu.matmul %103, %112, %cst_48 {dimension_numbers = #tpu.dot_dimension_numbers<[1], [0], [0], [1], [0, 0, 1, 1], [], []>} : vector<32x32xbf16>, vector<32x32xbf16>, vector<32x32xf32> -> vector<32x32xf32>
    %114 = arith.addf %110, %113 : vector<32x32xf32>
    %115 = vector.extract_strided_slice %103 {offsets = [1, 0], sizes = [31, 32], strides = [1, 1]} : vector<32x32xbf16> to vector<31x32xbf16>
    %116 = vector.extract_strided_slice %103 {offsets = [0, 0], sizes = [1, 32], strides = [1, 1]} : vector<32x32xbf16> to vector<1x32xbf16>
    %117 = tpu.concatenate %115, %116 in 0 : vector<31x32xbf16>, vector<1x32xbf16> -> vector<32x32xbf16>
    %118 = arith.mulf %117, %44 : vector<32x32xbf16>
    %c1_49 = arith.constant 1 : index
    %c2_50 = arith.constant 2 : index
    %c0_51 = arith.constant 0 : index
    %c0_52 = arith.constant 0 : index
    %119 = vector.load %arg1[%c1_49, %c2_50, %c0_51, %c0_52] : memref<2x3x32x32xbf16, #tpu.memory_space<vmem>>, vector<1x1x32x32xbf16>
    %120 = vector.shape_cast %119 : vector<1x1x32x32xbf16> to vector<32x32xbf16>
    %cst_53 = arith.constant dense<0.000000e+00> : vector<32x32xf32>
    %121 = tpu.matmul %118, %120, %cst_53 {dimension_numbers = #tpu.dot_dimension_numbers<[1], [0], [0], [1], [0, 0, 1, 1], [], []>} : vector<32x32xbf16>, vector<32x32xbf16>, vector<32x32xf32> -> vector<32x32xf32>
    %122 = arith.addf %114, %121 : vector<32x32xf32>
    %123 = vector.extract_strided_slice %122 {offsets = [0, 0], sizes = [1, 32], strides = [1, 1]} : vector<32x32xf32> to vector<1x32xf32>
    %124 = vector.broadcast %123 : vector<1x32xf32> to vector<32x32xf32>
    %125 = arith.subf %122, %124 : vector<32x32xf32>
    %cst_54 = arith.constant dense<0.000000e+00> : vector<32xf32>
    %126 = vector.multi_reduction <add>, %125, %cst_54 [0] : vector<32x32xf32> to vector<32xf32>
    %127 = vector.shape_cast %126 : vector<32xf32> to vector<1x32xf32>
    %128 = arith.mulf %125, %125 : vector<32x32xf32>
    %cst_55 = arith.constant dense<0.000000e+00> : vector<32xf32>
    %129 = vector.multi_reduction <add>, %128, %cst_55 [0] : vector<32x32xf32> to vector<32xf32>
    %130 = vector.shape_cast %129 : vector<32xf32> to vector<1x32xf32>
    %cst_56 = arith.constant 3.125000e-02 : f32
    %131 = vector.broadcast %cst_56 : f32 to vector<1x32xf32>
    %132 = arith.mulf %127, %131 : vector<1x32xf32>
    %cst_57 = arith.constant 3.125000e-02 : f32
    %133 = vector.broadcast %cst_57 : f32 to vector<1x32xf32>
    %134 = arith.mulf %130, %133 : vector<1x32xf32>
    %135 = arith.mulf %132, %132 : vector<1x32xf32>
    %136 = arith.subf %134, %135 : vector<1x32xf32>
    %cst_58 = arith.constant 0.000000e+00 : f32
    %137 = vector.broadcast %cst_58 : f32 to vector<1x32xf32>
    %138 = arith.maximumf %136, %137 : vector<1x32xf32>
    %139 = arith.addf %132, %123 : vector<1x32xf32>
    %c1_59 = arith.constant 1 : index
    %c0_60 = arith.constant 0 : index
    %c0_61 = arith.constant 0 : index
    %140 = vector.load %arg2[%c1_59, %c0_60, %c0_61] : memref<2x1x32xf32, #tpu.memory_space<vmem>>, vector<1x1x32xf32>
    %141 = vector.shape_cast %140 : vector<1x1x32xf32> to vector<1x32xf32>
    %c1_62 = arith.constant 1 : index
    %c0_63 = arith.constant 0 : index
    %c0_64 = arith.constant 0 : index
    %142 = vector.load %arg3[%c1_62, %c0_63, %c0_64] : memref<2x1x32xf32, #tpu.memory_space<vmem>>, vector<1x1x32xf32>
    %143 = vector.shape_cast %142 : vector<1x1x32xf32> to vector<1x32xf32>
    %c1_65 = arith.constant 1 : index
    %c0_66 = arith.constant 0 : index
    %c0_67 = arith.constant 0 : index
    %144 = vector.load %arg4[%c1_65, %c0_66, %c0_67] : memref<2x1x32xf32, #tpu.memory_space<vmem>>, vector<1x1x32xf32>
    %145 = vector.shape_cast %144 : vector<1x1x32xf32> to vector<1x32xf32>
    %cst_68 = arith.constant 9.99999974E-6 : f32
    %146 = vector.broadcast %cst_68 : f32 to vector<1x32xf32>
    %147 = arith.addf %138, %146 : vector<1x32xf32>
    %148 = math.rsqrt %147 : vector<1x32xf32>
    %149 = arith.mulf %143, %148 : vector<1x32xf32>
    %150 = arith.addf %139, %141 : vector<1x32xf32>
    %151 = arith.subf %141, %150 : vector<1x32xf32>
    %152 = arith.mulf %151, %149 : vector<1x32xf32>
    %153 = arith.addf %145, %152 : vector<1x32xf32>
    %154 = vector.broadcast %149 : vector<1x32xf32> to vector<32x32xf32>
    %155 = arith.mulf %122, %154 : vector<32x32xf32>
    %156 = vector.broadcast %153 : vector<1x32xf32> to vector<32x32xf32>
    %157 = arith.addf %155, %156 : vector<32x32xf32>
    %cst_69 = arith.constant 0.000000e+00 : f32
    %158 = vector.broadcast %cst_69 : f32 to vector<32x32xf32>
    %159 = arith.maximumf %157, %158 : vector<32x32xf32>
    %c0_70 = arith.constant 0 : index
    %c0_71 = arith.constant 0 : index
    %160 = vector.load %arg5[%c0_70, %c0_71] : memref<32x32xf32, #tpu.memory_space<vmem>>, vector<32x32xf32>
    tpu.vector_store %arg5[%c0_70, %c0_71], %159 {strides = array<i32>} : memref<32x32xf32, #tpu.memory_space<vmem>>, vector<32x32xf32>,
    return
  }
}

</mosaic_0001>

<bundles_post_ra>
// kernel: tpu_custom_call.1
= control target key start
LH: loop header
LB: loop body
LE: loop exit
PB: predicated region body
PF: predicated region fallthrough
CT: control target
= control target key end

     0   :  { %10 = vsyncpa [#allocation3], 0  ;;  %s1270_s0 = inlined_call_operand.hbm [shape: f32[32,32], index: 0, kind: input, shape index: {}]   ;;  %s1271_s1 = inlined_call_operand.hbm [shape: bf16[2,3,32,32], index: 1, kind: input, shape index: {}]   ;;  %s1272_s2 = inlined_call_operand.vmem [shape: f32[2,1,32], index: 2, kind: input, shape index: {}]   ;;  %s1273_s3 = inlined_call_operand.vmem [shape: f32[2,1,32], index: 3, kind: input, shape index: {}]   ;;  %s1274_s4 = inlined_call_operand.vmem [shape: f32[2,1,32], index: 4, kind: input, shape index: {}]   ;;  %s1275_s5 = inlined_call_operand.hbm [shape: f32[32,32], index: 5, kind: output, shape index: {}]  }
   0x1   :  { %11 = vsyncpa [#allocation6], 0 }
   0x2   :  { %12 = vsyncpa [#allocation4], 0  ;;  %s1082_s18 = smov [#allocation2]   ;;  %s1010_s22 = scalar_lea.hbm %s1270_s0, 512 }
   0x3   :  { %s18_s19 = sshll.u32 %s1082_s18, 4  ;;  %p1011_p0 = scmp.ne.s32.totalorder %s1270_s0, %s1010_s22  ;;  %s19_s19 = int_to_ptr.vmem [resolvable:$true] %s18_s19 }
   0x4   :  { %p1014_p1 = scmp.lt.u32.totalorder %s1010_s22, %s1270_s0 }
   0x6   :  { %p1016_p2 = pnand %p1014_p1, %p1011_p0 }
   0x8   :  { %1019 = shalt.err (!%p1016_p2)
}
   0x9   :  { %s1020_s27 = scalar_lea.vmem %s19_s19, 512  ;;  %p1025_p4 = scmp.lt.s32.totalorder %s19_s19, %s19_s19 }
   0xa   :  { %p1021_p3 = scmp.ne.s32.totalorder %s19_s19, %s1020_s27  ;;  %p1026_p5 = scmp.lt.s32.totalorder %s1020_s27, %s1020_s27 }
   0xc   :  { %p1027_p6 = por %p1026_p5, %p1025_p4 }
   0xe   :  { %p1028_p7 = pnand %p1027_p6, %p1021_p3 }
  0x10   :  { %1031 = shalt.err (!%p1028_p7)
}
  0x11   :  { %s1083_s28 = smov 128   ;;  %s1084_s29 = smov 8  }
  0x12   :  { %24 = dma.hbm_to_vmem [thread:$0]  %s1270_s0, 512, %s19_s19, [#allocation3], %s1083_s28, %s1083_s28, %s1084_s29  }
  0x13   :  { %s1085_s7 = smov [#allocation5]   ;;  %s1032_s11 = scalar_lea.hbm %s1271_s1, 1536 }
  0x14   :  { %s30_s8 = sshll.u32 %s1085_s7, 4  ;;  %p1033_p8 = scmp.ne.s32.totalorder %s1271_s1, %s1032_s11  ;;  %s31_s8 = int_to_ptr.vmem [resolvable:$true] %s30_s8 }
  0x15   :  { %p1036_p9 = scmp.lt.u32.totalorder %s1032_s11, %s1271_s1 }
  0x17   :  { %p1038_p10 = pnand %p1036_p9, %p1033_p8 }
  0x19   :  { %1041 = shalt.err (!%p1038_p10)
}
  0x1a   :  { %s1042_s16 = scalar_lea.vmem %s31_s8, 1536  ;;  %p1047_p12 = scmp.lt.s32.totalorder %s31_s8, %s31_s8 }
  0x1b   :  { %p1043_p11 = scmp.ne.s32.totalorder %s31_s8, %s1042_s16  ;;  %p1048_p13 = scmp.lt.s32.totalorder %s1042_s16, %s1042_s16 }
  0x1d   :  { %p1049_p0 = por %p1048_p13, %p1047_p12 }
  0x1f   :  { %p1050_p1 = pnand %p1049_p0, %p1043_p11 }
  0x21   :  { %1053 = shalt.err (!%p1050_p1)
}
  0x22   :  { %s1086_s0 = smov 64   ;;  %s1087_s17 = smov 4  }
  0x23   :  { %36 = dma.hbm_to_vmem [thread:$0]  %s1271_s1, 1536, %s31_s8, [#allocation6], %s1086_s0, %s1086_s0, %s1087_s17  }
  0x24   :  { %1076 = dma.done.wait [#allocation3], 512  }
  0x25   :  { %1077 = vsyncadd [#allocation3], 4294966784 }
  0x26   :  { %1078 = dma.done.wait [#allocation6], 1536  }
  0x27   :  { %1079 = vsyncadd [#allocation6], 4294965760  ;;  %v50_v0 = vlaneseq  ;;  %vm222_vm0 = vcmask 261120   ;;  %vm182_vm1 = vsmask.f32 256  ;;  %v994_v7 = vld [vmem:[#allocation5 + $0x10] sm:$0xff]  }
  0x28   :  { %v995_v9 = vld [vmem:[#allocation5 + $0x18] sm:$0xff]   ;;  %921 = vmatprep.subr.bf16.mxu0 %v994_v7  ;;  %v171_v10 = vld [vmem:[#allocation2] sm:$0xff]  ;;  %v172_v11 = vld [vmem:[#allocation2 + $0x8] sm:$0xff]  ;;  %v1088_v17 = vmov 0.0   ;;  %vm196_vm3 = vcmask 1040384   ;;  %v1089_v29 = vmov 1.0  }
  0x29   :  { %v1148_v1 = vshrl.u32 %v50_v0, 7  ;;  %v173_v12 = vld [vmem:[#allocation2 + $0x10] sm:$0xff]  ;;  %922 = vmatpush3.bf16.msra.mxu0 %v994_v7  ;;  %v175_v15 = vpack.c.bf16 %v172_v11, %v171_v10  ;;  %v174_v16 = vld [vmem:[#allocation2 + $0x18] sm:$0xff]  ;;  %v996_v20 = vld [vmem:[#allocation5] sm:$0xff]   ;;  %vm343_vm7 = vsmask.f32 7424 }
  0x2a   :  { %923 = vmatprep.subr.bf16.mxu0 %v995_v9  ;;  %v176_v19 = vpack.c.bf16 %v174_v16, %v173_v12  ;;  %v997_v25 = vld [vmem:[#allocation5 + $0x8] sm:$0xff]   ;;  %vm1158_vm5 = vmand %vm196_vm3, %vm182_vm1  ;;  %v998_v38 = vld [vmem:[#allocation5 + $0x20] sm:$0xff]   ;;  %vm352_vm9 = vcmask 1047552  }
  0x2b   :  { %v59_v2 = vand.u32 15, %v1148_v1  ;;  %v53_v3 = vadd.s32 16, %v1148_v1  ;;  %v52_v4 = vadd.s32 8, %v1148_v1  ;;  %v54_v14 = vadd.s32 24, %v1148_v1  ;;  %925 = vmatprep.mubr.msk.bf16.mxu0 %vm222_vm0, %v175_v15  ;;  %v999_v50 = vld [vmem:[#allocation5 + $0x28] sm:$0xff]   ;;  %vm1178_vm10 = vmand %vm352_vm9, %vm343_vm7  ;;  %v1000_v57 = vld [vmem:[#allocation5 + $0x40] sm:$0xff]  }
  0x2c   :  { %v184_v22 = vshrl.u32 %v175_v15, 16  ;;  %v187_v23 = vshll.u32 %v175_v15, 16  ;;  %v178_v24 = vshrl.u32 %v176_v19, 16  ;;  %v190_v28 = vshll.u32 %v176_v19, 16  ;;  %945 = vmatprep.subr.bf16.mxu1 %v1000_v57  ;;  %v1001_v58 = vld [vmem:[#allocation5 + $0x48] sm:$0xff]   ;;  %v1188_v59 = vld [vmem:[#allocation5 + $0x30] sm:$0xff]  }
  0x2d   :  { %v103_v5 = vadd.s32 4294967295, %v59_v2  ;;  %v73_v6 = vand.u32 15, %v53_v3  ;;  %v66_v8 = vand.u32 15, %v52_v4  ;;  %v80_v26 = vand.u32 15, %v54_v14  ;;  %924 = vmatpush3.bf16.msra.mxu0 %v995_v9  ;;  %946 = vmatpush3.bf16.msra.mxu1 %v1000_v57 }
  0x2e   :  { %v186_v27 = vrot.slane %v184_v22, 7  ;;  %v344_v31 = vrot.slane %v187_v23, 1  ;;  %929 = vmatprep.subr.bf16.mxu0 %v996_v20  ;;  %v180_v32 = vrot.slane %v178_v24, 7  ;;  %v346_v37 = vrot.slane %v190_v28, 1  ;;  %947 = vmatprep.subr.bf16.mxu1 %v1001_v58 }
  0x2f   :  { %vm107_vm2 = vcmp.ge.s32.totalorder %v103_v5, 0  ;;  %v105_v13 = vadd.s32 4294967295, %v73_v6  ;;  %v138_v21 = vadd.s32 1, %v66_v8  ;;  %v140_v47 = vadd.s32 1, %v80_v26 }
  0x30   :  { %v866_v18 = vsel %vm107_vm2, 1.0, %v1088_v17  ;;  %v189_v35 = vor.u32 %v187_v23, %v186_v27  ;;  %926 = vmatmul.mubr.msk.bf16.vlgmr.msra.gmra.mrb[0].mxu0 %vm222_vm0, %v176_v19  ;;  %v192_v39 = vor.u32 %v190_v28, %v180_v32  ;;  %v345_v41 = vor.u32 %v344_v31, %v184_v22 }
  0x31   :  { %vm109_vm4 = vcmp.ge.s32.totalorder %v105_v13, 0  ;;  %v1155_v30 = vpack.c.bf16 %v1089_v29, %v866_v18  ;;  %vm146_vm6 = vcmp.lt.s32.totalorder %v138_v21, 16  ;;  %930 = vmatpush3.bf16.msra.mxu0 %v996_v20  ;;  %vm148_vm8 = vcmp.lt.s32.totalorder %v140_v47, 16  ;;  %948 = vmatpush3.bf16.msra.mxu1 %v1001_v58  ;;  %v477_v47 = vld [vmem:[%s1272_s2] sm:$0x1] }
  0x32   :  { %v867_v34 = vsel %vm109_vm4, 1.0, %v1088_v17  ;;  %v868_v36 = vsel %vm146_vm6, 1.0, %v1088_v17  ;;  %v198_v40 = vsel %vm1158_vm5, %v180_v32, %v189_v35  ;;  %931 = vmatprep.subr.bf16.mxu0 %v997_v25  ;;  %v193_v44 = vsel %vm182_vm1, %v186_v27, %v192_v39  ;;  %953 = vmatprep.subr.bf16.mxu1 %v1188_v59 }
  0x33   :  { %v199_v42 = vmul.bf16 %v198_v40, %v1155_v30  ;;  %v1167_v43 = vpack.c.bf16 %v1089_v29, %v867_v34  ;;  %v1170_v45 = vpack.c.bf16 %v868_v36, %v1089_v29  ;;  %v347_v46 = vsel %vm343_vm7, %v345_v41, %v346_v37 }
  0x34   :  { %v348_v51 = vor.u32 %v346_v37, %v178_v24  ;;  %v869_v52 = vsel %vm148_vm8, 1.0, %v1088_v17  ;;  %v1192_v60 = vsub.s32 0, %v1148_v1 }
  0x35   :  { %933 = vmatprep.mubr.msk.bf16.mxu0 %vm222_vm0, %v199_v42  ;;  %932 = vmatpush3.bf16.msra.mxu0 %v997_v25  ;;  %v200_v48 = vmul.bf16 %v193_v44, %v1167_v43  ;;  %v355_v49 = vmul.bf16 %v347_v46, %v1170_v45  ;;  %v1182_v54 = vpack.c.bf16 %v869_v52, %v1089_v29 }
  0x36   :  { %937 = vmatprep.subr.bf16.mxu0 %v998_v38  ;;  %v354_v55 = vsel %vm1178_vm10, %v348_v51, %v344_v31 }
  0x37   :  { %v356_v56 = vmul.bf16 %v354_v55, %v1182_v54  ;;  %v479_v55 = vld [vmem:[%s1274_s4] sm:$0x1] }
  0x3c   :  { %934 = vmatmul.mubr.msk.bf16.vlgmr.msra.gmra.mrb[0].mxu0 %vm222_vm0, %v200_v48 }
  0x3d   :  { %938 = vmatpush3.bf16.msra.mxu0 %v998_v38  ;;  %941 = vmatprep.mubr.msk.bf16.mxu0 %vm222_vm0, %v355_v49  ;;  %v478_v49 = vld [vmem:[%s1273_s3] sm:$0x1] }
  0x3e   :  { %939 = vmatprep.subr.bf16.mxu0 %v999_v50 }
  0x41   :  { %940 = vmatpush3.bf16.msra.mxu0 %v999_v50 }
  0x48   :  { %942 = vmatmul.mubr.msk.bf16.vlgmr.msra.gmra.mrb[0].mxu0 %vm222_vm0, %v356_v56 }
 0x11b   :  { %v943_v61 = vpop.f32.mrb[0].mxu0 }
 0x11c   :  { %v414_v62 = vpop.f32.mrb[1].mxu0 }
 0x11d   :  { %v436_v63 = vrot.slane %v414_v62, %v1192_v60  ;;  %v944_v0 = vpop.f32.mrb[2].mxu0 }
 0x11e   :  { %v417_v2 = vpop.f32.mrb[3].mxu0 }
 0x11f   :  { %v437_v3 = vsub.f32 %v414_v62, %v436_v63  ;;  %v440_v4 = vsub.f32 %v944_v0, %v436_v63  ;;  %v438_v5 = vsub.f32 %v417_v2, %v436_v63  ;;  %v439_v6 = vsub.f32 %v943_v61, %v436_v63 }
 0x121   :  { %v454_v7 = vmul.f32 %v437_v3, %v437_v3  ;;  %v441_v8 = vsel %vm222_vm0, %v437_v3, 0.0  ;;  %v442_v9 = vsel %vm222_vm0, %v438_v5, 0.0  ;;  %v455_v10 = vmul.f32 %v438_v5, %v438_v5 }
 0x122   :  { %v456_v11 = vmul.f32 %v439_v6, %v439_v6  ;;  %v443_v12 = vadd.f32 %v442_v9, %v441_v8  ;;  %v457_v13 = vmul.f32 %v440_v4, %v440_v4  ;;  %v444_v14 = vsel %vm222_vm0, %v439_v6, 0.0 }
 0x123   :  { %v458_v1 = vsel %vm222_vm0, %v454_v7, 0.0  ;;  %v459_v15 = vsel %vm222_vm0, %v455_v10, 0.0  ;;  %v446_v18 = vsel %vm222_vm0, %v440_v4, 0.0 }
 0x124   :  { %v445_v16 = vadd.f32 %v444_v14, %v443_v12  ;;  %v460_v17 = vadd.f32 %v459_v15, %v458_v1  ;;  %v461_v19 = vsel %vm222_vm0, %v456_v11, 0.0  ;;  %v463_v22 = vsel %vm222_vm0, %v457_v13, 0.0 }
 0x126   :  { %v447_v20 = vadd.f32 %v446_v18, %v445_v16  ;;  %v462_v21 = vadd.f32 %v461_v19, %v460_v17  ;;  %v1003_v16 = vld [vmem:[#allocation5 + $0x38] sm:$0xff]  }
 0x128   :  { %v448_v23 = vrot.slane %v447_v20, 4  ;;  %v464_v24 = vadd.f32 %v463_v22, %v462_v21  ;;  %v1004_v21 = vld [vmem:[#allocation5 + $0x50] sm:$0xff]  }
 0x12a   :  { %v449_v25 = vadd.f32 %v448_v23, %v447_v20  ;;  %v465_v26 = vrot.slane %v464_v24, 4 }
 0x12c   :  { %v450_v27 = vrot.slane %v449_v25, 2  ;;  %v466_v28 = vadd.f32 %v465_v26, %v464_v24 }
 0x12e   :  { %v451_v29 = vadd.f32 %v450_v27, %v449_v25  ;;  %v467_v31 = vrot.slane %v466_v28, 2 }
 0x130   :  { %v452_v32 = vrot.slane %v451_v29, 1  ;;  %v468_v34 = vadd.f32 %v467_v31, %v466_v28 }
 0x132   :  { %v453_v35 = vadd.f32 %v452_v32, %v451_v29  ;;  %v469_v36 = vrot.slane %v468_v34, 1  ;;  %v1005_v32 = vld [vmem:[#allocation5 + $0x58] sm:$0xff]  }
 0x134   :  { %v470_v37 = vadd.f32 %v469_v36, %v468_v34  ;;  %v471_v38 = vmul.f32 0.03125, %v453_v35 }
 0x136   :  { %v472_v39 = vmul.f32 0.03125, %v470_v37  ;;  %v473_v40 = vmul.f32 %v471_v38, %v471_v38  ;;  %v476_v41 = vadd.f32 %v471_v38, %v414_v62 }
 0x138   :  { %v474_v42 = vsub.f32 %v472_v39, %v473_v40  ;;  %v483_v48 = vadd.f32 %v477_v47, %v476_v41 }
 0x13a   :  { %v475_v44 = vmax.f32 %v474_v42, 0.0  ;;  %v484_v52 = vsub.f32 %v477_v47, %v483_v48 }
 0x13c   :  { %v480_v46 = vadd.f32 1e-05, %v475_v44 }
 0x13e   :  { %1006 = vrsqrt.f32 %v480_v46 }
 0x148   :  { %v1007_v50 = vpop.eup %1006 }
 0x149   :  { %v482_v51 = vmul.f32 %v1007_v50, %v478_v49 }
 0x14b   :  { %v485_v56 = vmul.f32 %v484_v52, %v482_v51  ;;  %v491_v57 = vrot.slane %v482_v51, %v1192_v60 }
 0x14d   :  { %v486_v58 = vadd.f32 %v485_v56, %v479_v55  ;;  %v494_v63 = vmul.f32 %v491_v57, %v417_v2  ;;  %v493_v3 = vmul.f32 %v491_v57, %v414_v62  ;;  %v495_v4 = vmul.f32 %v943_v61, %v491_v57 }
 0x14e   :  { %v496_v5 = vmul.f32 %v944_v0, %v491_v57 }
 0x14f   :  { %v501_v6 = vrot.slane %v486_v58, %v1192_v60 }
 0x151   :  { %v504_v7 = vadd.f32 %v501_v6, %v494_v63  ;;  %v503_v8 = vadd.f32 %v501_v6, %v493_v3  ;;  %v505_v9 = vadd.f32 %v501_v6, %v495_v4  ;;  %v506_v10 = vadd.f32 %v501_v6, %v496_v5 }
 0x153   :  { %v508_v11 = vmax.f32 %v504_v7, 0.0  ;;  %v507_v12 = vmax.f32 %v503_v8, 0.0  ;;  %v509_v1 = vmax.f32 %v505_v9, 0.0  ;;  %v510_v13 = vmax.f32 %v506_v10, 0.0 }
 0x155   :  { %v511_v14 = vpack.c.bf16 %v508_v11, %v507_v12  ;;  %v512_v15 = vpack.c.bf16 %v510_v13, %v509_v1 }
 0x157   :  { %v519_v17 = vshrl.u32 %v511_v14, 16  ;;  %v522_v18 = vshll.u32 %v511_v14, 16  ;;  %949 = vmatprep.mubr.msk.bf16.mxu1 %vm222_vm0, %v511_v14  ;;  %v514_v62 = vshrl.u32 %v512_v15, 16  ;;  %v525_v61 = vshll.u32 %v512_v15, 16 }
 0x158   :  { %950 = vmatmul.mubr.msk.bf16.vlgmr.msra.gmra.mrb[0].mxu1 %vm222_vm0, %v512_v15 }
 0x159   :  { %v521_v0 = vrot.slane %v519_v17, 7  ;;  %v676_v2 = vrot.slane %v522_v18, 1  ;;  %954 = vmatpush3.bf16.msra.mxu1 %v1188_v59  ;;  %v516_v19 = vrot.slane %v514_v62, 7  ;;  %v678_v20 = vrot.slane %v525_v61, 1 }
 0x15a   :  { %955 = vmatprep.subr.bf16.mxu1 %v1003_v16 }
 0x15b   :  { %v524_v22 = vor.u32 %v522_v18, %v521_v0  ;;  %v677_v23 = vor.u32 %v676_v2, %v519_v17  ;;  %v527_v24 = vor.u32 %v525_v61, %v516_v19  ;;  %v680_v25 = vor.u32 %v678_v20, %v514_v62 }
 0x15d   :  { %956 = vmatpush3.bf16.msra.mxu1 %v1003_v16  ;;  %v531_v26 = vsel %vm1158_vm5, %v516_v19, %v524_v22  ;;  %v528_v27 = vsel %vm182_vm1, %v521_v0, %v527_v24  ;;  %v679_v28 = vsel %vm343_vm7, %v677_v23, %v678_v20  ;;  %v684_v29 = vsel %vm1178_vm10, %v680_v25, %v676_v2  ;;  %v894_v2 = vld [vmem:[%s1272_s2 + $0x1] sm:$0x1]  ;;  %s1090_s2 = smov [#allocation7]  }
 0x15e   :  { %v532_v59 = vmul.bf16 %v531_v26, %v1155_v30  ;;  %961 = vmatprep.subr.bf16.mxu1 %v1004_v21  ;;  %v533_v31 = vmul.bf16 %v528_v27, %v1167_v43  ;;  %v685_v34 = vmul.bf16 %v679_v28, %v1170_v45  ;;  %v686_v33 = vmul.bf16 %v684_v29, %v1182_v54  ;;  %v895_v20 = vld [vmem:[%s1273_s3 + $0x1] sm:$0x1]  ;;  %s853_s8 = sshll.u32 %s1090_s2, 4  ;;  %s854_s8 = int_to_ptr.vmem [resolvable:$true] %s853_s8 }
 0x15f   :  { %v896_v24 = vld [vmem:[%s1274_s4 + $0x1] sm:$0x1]  ;;  %s1054_s3 = scalar_lea.vmem %s854_s8, 512  ;;  %p1059_p3 = scmp.lt.s32.totalorder %s854_s8, %s854_s8 }
 0x160   :  { %957 = vmatprep.mubr.msk.bf16.mxu1 %vm222_vm0, %v532_v59  ;;  %p1055_p2 = scmp.ne.s32.totalorder %s854_s8, %s1054_s3  ;;  %p1060_p4 = scmp.lt.s32.totalorder %s1054_s3, %s1054_s3 }
 0x162   :  { %p1061_p5 = por %p1060_p4, %p1059_p3 }
 0x164   :  { %958 = vmatmul.mubr.msk.bf16.vlgmr.msra.gmra.mrb[0].mxu1 %vm222_vm0, %v533_v31  ;;  %p1062_p6 = pnand %p1061_p5, %p1055_p2 }
 0x165   :  { %962 = vmatpush3.bf16.msra.mxu1 %v1004_v21  ;;  %965 = vmatprep.mubr.msk.bf16.mxu1 %vm222_vm0, %v685_v34 }
 0x166   :  { %963 = vmatprep.subr.bf16.mxu1 %v1005_v32 }
 0x169   :  { %964 = vmatpush3.bf16.msra.mxu1 %v1005_v32 }
 0x170   :  { %966 = vmatmul.mubr.msk.bf16.vlgmr.msra.gmra.mrb[0].mxu1 %vm222_vm0, %v686_v33 }
 0x243   :  { %v967_v30 = vpop.f32.mrb[0].mxu1 }
 0x244   :  { %v744_v53 = vpop.f32.mrb[1].mxu1 }
 0x245   :  { %v766_v35 = vrot.slane %v744_v53, %v1192_v60  ;;  %v968_v36 = vpop.f32.mrb[2].mxu1 }
 0x246   :  { %v747_v43 = vpop.f32.mrb[3].mxu1 }
 0x247   :  { %v767_v37 = vsub.f32 %v744_v53, %v766_v35  ;;  %v770_v38 = vsub.f32 %v968_v36, %v766_v35  ;;  %v768_v45 = vsub.f32 %v747_v43, %v766_v35  ;;  %v769_v39 = vsub.f32 %v967_v30, %v766_v35 }
 0x249   :  { %v784_v40 = vmul.f32 %v767_v37, %v767_v37  ;;  %v771_v41 = vsel %vm222_vm0, %v767_v37, 0.0  ;;  %v772_v42 = vsel %vm222_vm0, %v768_v45, 0.0  ;;  %v785_v44 = vmul.f32 %v768_v45, %v768_v45 }
 0x24a   :  { %v786_v46 = vmul.f32 %v769_v39, %v769_v39  ;;  %v773_v54 = vadd.f32 %v772_v42, %v771_v41  ;;  %v787_v48 = vmul.f32 %v770_v38, %v770_v38  ;;  %v774_v49 = vsel %vm222_vm0, %v769_v39, 0.0 }
 0x24b   :  { %v788_v47 = vsel %vm222_vm0, %v784_v40, 0.0  ;;  %v789_v50 = vsel %vm222_vm0, %v785_v44, 0.0  ;;  %v776_v55 = vsel %vm222_vm0, %v770_v38, 0.0 }
 0x24c   :  { %v775_v51 = vadd.f32 %v774_v49, %v773_v54  ;;  %v790_v52 = vadd.f32 %v789_v50, %v788_v47  ;;  %v791_v56 = vsel %vm222_vm0, %v786_v46, 0.0  ;;  %v793_v63 = vsel %vm222_vm0, %v787_v48, 0.0 }
 0x24e   :  { %v777_v57 = vadd.f32 %v776_v55, %v775_v51  ;;  %v792_v58 = vadd.f32 %v791_v56, %v790_v52 }
 0x250   :  { %v778_v3 = vrot.slane %v777_v57, 4  ;;  %v794_v4 = vadd.f32 %v793_v63, %v792_v58 }
 0x252   :  { %v779_v5 = vadd.f32 %v778_v3, %v777_v57  ;;  %v795_v6 = vrot.slane %v794_v4, 4 }
 0x254   :  { %v780_v7 = vrot.slane %v779_v5, 2  ;;  %v796_v8 = vadd.f32 %v795_v6, %v794_v4 }
 0x256   :  { %v781_v9 = vadd.f32 %v780_v7, %v779_v5  ;;  %v797_v10 = vrot.slane %v796_v8, 2 }
 0x258   :  { %v782_v11 = vrot.slane %v781_v9, 1  ;;  %v798_v12 = vadd.f32 %v797_v10, %v796_v8 }
 0x25a   :  { %v783_v1 = vadd.f32 %v782_v11, %v781_v9  ;;  %v799_v13 = vrot.slane %v798_v12, 1 }
 0x25c   :  { %v800_v14 = vadd.f32 %v799_v13, %v798_v12  ;;  %v801_v15 = vmul.f32 0.03125, %v783_v1 }
 0x25e   :  { %v802_v16 = vmul.f32 0.03125, %v800_v14  ;;  %v803_v17 = vmul.f32 %v801_v15, %v801_v15  ;;  %v806_v18 = vadd.f32 %v801_v15, %v744_v53 }
 0x260   :  { %v804_v62 = vsub.f32 %v802_v16, %v803_v17  ;;  %v816_v19 = vadd.f32 %v894_v2, %v806_v18 }
 0x262   :  { %v805_v61 = vmax.f32 %v804_v62, 0.0  ;;  %v817_v23 = vsub.f32 %v894_v2, %v816_v19 }
 0x264   :  { %v813_v0 = vadd.f32 1e-05, %v805_v61 }
 0x266   :  { %1008 = vrsqrt.f32 %v813_v0 }
 0x270   :  { %v1009_v21 = vpop.eup %1008 }
 0x271   :  { %v815_v22 = vmul.f32 %v1009_v21, %v895_v20 }
 0x273   :  { %v818_v25 = vmul.f32 %v817_v23, %v815_v22  ;;  %v824_v26 = vrot.slane %v815_v22, %v1192_v60 }
 0x275   :  { %v819_v27 = vadd.f32 %v896_v24, %v818_v25  ;;  %v827_v28 = vmul.f32 %v824_v26, %v747_v43  ;;  %v826_v29 = vmul.f32 %v824_v26, %v744_v53  ;;  %v828_v59 = vmul.f32 %v967_v30, %v824_v26 }
 0x276   :  { %v829_v31 = vmul.f32 %v968_v36, %v824_v26 }
 0x277   :  { %v834_v32 = vrot.slane %v819_v27, %v1192_v60 }
 0x279   :  { %v837_v34 = vadd.f32 %v834_v32, %v827_v28  ;;  %v836_v33 = vadd.f32 %v834_v32, %v826_v29  ;;  %v838_v35 = vadd.f32 %v834_v32, %v828_v59  ;;  %v839_v37 = vadd.f32 %v834_v32, %v829_v31 }
 0x27b   :  { %v841_v38 = vmax.f32 %v837_v34, 0.0  ;;  %v840_v45 = vmax.f32 %v836_v33, 0.0  ;;  %v842_v39 = vmax.f32 %v838_v35, 0.0  ;;  %v843_v40 = vmax.f32 %v839_v37, 0.0 }
 0x27d   :  { %845 = vst.msk [vmem:[#allocation7 + $0x8] sm:$0xff] %vm222_vm0, %v841_v38  ;;  %844 = vst.msk [vmem:[#allocation7] sm:$0xff] %vm222_vm0, %v840_v45 }
 0x27e   :  { %846 = vst.msk [vmem:[#allocation7 + $0x10] sm:$0xff] %vm222_vm0, %v842_v39  ;;  %847 = vst.msk [vmem:[#allocation7 + $0x18] sm:$0xff] %vm222_vm0, %v843_v40 }
 0x27f   :  { %1065 = shalt.err (!%p1062_p6)
}
 0x280   :  { %s1066_s10 = scalar_lea.hbm %s1275_s5, 512 }
 0x281   :  { %p1067_p7 = scmp.ne.s32.totalorder %s1275_s5, %s1066_s10  ;;  %p1070_p8 = scmp.lt.u32.totalorder %s1066_s10, %s1275_s5 }
 0x283   :  { %p1072_p9 = pnand %p1070_p8, %p1067_p7 }
 0x285   :  { %1075 = shalt.err (!%p1072_p9)
}
 0x286   :  { %859 = dma.vmem_to_hbm [thread:$0]  %s854_s8, 512, %s1275_s5, [#allocation4], %s1083_s28, %s1083_s28, %s1084_s29  }
 0x287   :  { %1080 = dma.done.wait [#allocation4], 512  }
 0x288   :  { %1081 = vsyncadd [#allocation4], 4294966784 }
 0x289   :  { %863 = vsyncpa [#allocation3], 1 }
 0x28a   :  { %864 = vsyncpa [#allocation6], 1 }
 0x28b   :  { %865 = vsyncpa [#allocation4], 1 }

</bundles_post_ra>
